<compile_context>
chip_gen: v5e
topology: v5e:2x2
jax: 0.10.0
libtpu: 0.0.40
codegen_flags: <defaults>
</compile_context>

<pallas_src>
import functools
import math
from functools import partial

import jax
import jax.numpy as jnp
from jax.experimental import pallas as pl
from jax.experimental.pallas import tpu as pltpu

_LANE = 128
_MAX_LANE_DIM = 65536          # cap on a collapsed trailing dim used as the lane axis


@functools.lru_cache(maxsize=1)
def _budgets():
    """(native bytes per grid-step block, vmem_limit_bytes), gated by generation."""
    try:
        vmem_cap = int(pltpu.get_tpu_info().vmem_capacity_bytes)
    except Exception:
        # Unknown part: fall back to the conservative, previously-validated config.
        return 2 * 1024 * 1024, 32 * 1024 * 1024
    if vmem_cap >= 96 * 1024 * 1024:            # v5e / v6e: 128 MiB VMEM per core
        return 6 * 1024 * 1024, 96 * 1024 * 1024
    return 4 * 1024 * 1024, 48 * 1024 * 1024    # v7x: 64 MiB VMEM per TensorCore


def _plan_view(shape, n):
    """Return (rows, W) with rows * W == n (a *free* row-major reshape), or None.

    Preference:
      1. numel divisible by 128 -> fully-flat lane-dense view with wide lanes.
      2. trailing dims collapse into a lane axis of >= 128 elements.
    Tiny arrays (rows < 8) and pathological big-but-unfactorable shapes return
    None and take the rare pad fallback instead.
    """
    if n % _LANE == 0 and n // _LANE >= 8:
        for w in (4096, 2048, 1024, 512, 256, 128):
            if n % w == 0 and n // w >= 8:
                return n // w, w
    c = 1
    for d in reversed(shape):
        c *= int(d)
        if c >= _LANE:
            break
    if _LANE <= c <= _MAX_LANE_DIM and n // c >= 8:
        return n // c, c
    return None


def _pick_tm(rows, W, elems_per_block):
    if rows * W <= elems_per_block:
        return rows                              # single full-array block
    tm = (elems_per_block // W) // 8 * 8
    return max(8, min(tm, (rows // 8) * 8))


@partial(jax.jit, static_argnames=("scale", "shift"))
def _cosine_pallas(x, *, scale, shift):
    """Elementwise 0.5 - 0.5*cos(scale*x + shift) via a Pallas TPU kernel."""
    orig_shape = x.shape
    out_dtype = x.dtype if jnp.issubdtype(x.dtype, jnp.floating) else jnp.float32
    n = x.size
    if n == 0:
        return jnp.zeros(orig_shape, out_dtype)

    block_bytes, vmem_limit = _budgets()
    itemsize = max(jnp.dtype(x.dtype).itemsize, jnp.dtype(out_dtype).itemsize)
    elems_per_block = max(8 * _LANE, block_bytes // itemsize)

    plan = _plan_view(orig_shape, n)
    if plan is not None:
        rows, W = plan
        x2 = x.reshape(rows, W)                  # free reshape: no HBM pass
        pad_tail = 0
    else:
        # Rare fallback (tiny arrays, or huge arrays whose trailing dims cannot
        # form a lane axis): pad to an (>=8, 128) slab. The extra pad + slice
        # passes only ever touch tiny or pathological inputs.
        W = _LANE
        rows = max(8, pl.cdiv(n, W))
        pad_tail = rows * W - n
        x2 = jnp.pad(x.reshape(-1), (0, pad_tail)).reshape(rows, W)

    tm = _pick_tm(rows, W, elems_per_block)
    grid = (pl.cdiv(rows, tm),)                  # last block may be partial (masked)

    def kernel(x_ref, o_ref):
        # scale / shift are Python floats baked in as constants (no SMEM operands).
        # Compute stays f32: v5e has no bf16 VPU/EUP and bf16 cos loses accuracy.
        # TODO(synk): if a v7x bundle dump shows VALU-bound bf16 streaming, do the
        # math in bf16 on v6e/v7x and fold the affine into the cos range reduction.
        xf = x_ref[...].astype(jnp.float32)      # per-tile upcast, hidden under DMA
        y = 0.5 - 0.5 * jnp.cos(scale * xf + shift)
        o_ref[...] = y.astype(o_ref.dtype)

    out2 = pl.pallas_call(
        kernel,
        out_shape=jax.ShapeDtypeStruct((rows, W), out_dtype),
        grid=grid,
        in_specs=[pl.BlockSpec((tm, W), lambda i: (i, 0))],
        out_specs=pl.BlockSpec((tm, W), lambda i: (i, 0)),
        compiler_params=pltpu.CompilerParams(
            dimension_semantics=("parallel",),   # 2-TC split on v7x megacore
            vmem_limit_bytes=vmem_limit,
        ),
    )(x2)

    if pad_tail:
        return out2.reshape(-1)[:n].reshape(orig_shape)
    return out2.reshape(orig_shape)


class ValueMapping:
    """Minimal stand-in for the original ValueMapping (only v_min/v_max used)."""

    def __init__(self, v_min: float, v_max: float):
        self.v_min = float(v_min)
        self.v_max = float(v_max)


class CosinePallas:
    """JAX/Pallas analogue of energies.quality_function_modules.Cosine."""

    def __init__(self, mapping: ValueMapping):
        self.v_min = float(mapping.v_min)
        self.v_max = float(mapping.v_max)
        # y = -cos((x - v_min)/(v_max - v_min) * pi)*0.5 + 0.5
        #   = 0.5 - 0.5*cos(scale*x + shift)
        self._scale = math.pi / (self.v_max - self.v_min)
        self._shift = -self.v_min * self._scale

    def __call__(self, x):
        return _cosine_pallas(x, scale=self._scale, shift=self._shift)


if __name__ == "__main__":
    mapping = ValueMapping(v_min=-1.0, v_max=3.0)
    mod = CosinePallas(mapping)

    def ref_fn(x):
        xf = x.astype(jnp.float32)
        return (-jnp.cos((xf - mapping.v_min) / (mapping.v_max - mapping.v_min)
                         * jnp.pi) * 0.5 + 0.5)

    keys = jax.random.split(jax.random.PRNGKey(0), 6)

    # --- main check: NCHW f32 input (aligned, zero-copy, single block) ---
    x = jax.random.uniform(keys[0], (2, 4, 16, 16), jnp.float32,
                           minval=-2.0, maxval=4.0)
    y = jax.block_until_ready(mod(x))
    assert y.shape == x.shape and y.dtype == x.dtype
    assert jnp.allclose(y, ref_fn(x), atol=1e-4, rtol=1e-4)

    # --- bf16 streams natively; per-tile upcast inside the kernel ---
    xb = x.astype(jnp.bfloat16)
    yb = jax.block_until_ready(mod(xb))
    assert yb.shape == xb.shape and yb.dtype == jnp.bfloat16
    assert jnp.allclose(yb.astype(jnp.float32), ref_fn(xb), atol=2e-2, rtol=2e-2)

    # --- misaligned numel, lane axis = trailing dim (zero-copy, no pad) ---
    xo = jax.random.uniform(keys[1], (9, 1000), jnp.float32, minval=-2.0, maxval=4.0)
    yo = jax.block_until_ready(mod(xo))
    assert yo.shape == xo.shape
    assert jnp.allclose(yo, ref_fn(xo), atol=1e-4, rtol=1e-4)

    # --- tiny awkward shape -> pad fallback path ---
    xt = jax.random.uniform(keys[2], (3, 5, 7), jnp.float32, minval=-2.0, maxval=4.0)
    yt = jax.block_until_ready(mod(xt))
    assert yt.shape == xt.shape
    assert jnp.allclose(yt, ref_fn(xt), atol=1e-4, rtol=1e-4)

    # --- integer input streams natively; output promoted to f32 ---
    xi = jax.random.randint(keys[3], (4, 33), -1, 4)
    yi = jax.block_until_ready(mod(xi))
    assert yi.shape == xi.shape and yi.dtype == jnp.float32
    assert jnp.allclose(yi, ref_fn(xi), atol=1e-4, rtol=1e-4)

    # --- multi-block grid with partial last block, aligned flat view ---
    xa = jax.random.uniform(keys[4], (16, 512, 256), jnp.float32,
                            minval=-2.0, maxval=4.0)
    ya = jax.block_until_ready(mod(xa))
    assert ya.shape == xa.shape
    assert jnp.allclose(ya, ref_fn(xa), atol=1e-4, rtol=1e-4)

    # --- multi-block grid with partial last block, misaligned trailing view ---
    xm = jax.random.uniform(keys[5], (1800, 1000), jnp.float32,
                            minval=-2.0, maxval=4.0)
    ym = jax.block_until_ready(mod(xm))
    assert ym.shape == xm.shape
    assert jnp.allclose(ym, ref_fn(xm), atol=1e-4, rtol=1e-4)

    print("KERNEL_OK")
</pallas_src>

<mosaic_0001>
module attributes {stable_mosaic.version = 11 : i64} {
  func.func @kernel(%arg0: i32, %arg1: memref<8x256xf32, #tpu.memory_space<vmem>>, %arg2: memref<8x256xf32, #tpu.memory_space<vmem>>) attributes {dimension_semantics = [#tpu.dimension_semantics<parallel>], iteration_bounds = array<i64: 1>, scalar_prefetch = 0 : i64, scratch_operands = 0 : i64, tpu.core_type = #tpu.core_type<tc>, window_params = [{transform_indices = @transform_0, window_bounds = array<i64: 8, 256>}, {transform_indices = @transform_1, window_bounds = array<i64: 8, 256>}]} {
    %c0 = arith.constant 0 : index
    %c0_0 = arith.constant 0 : index
    %0 = vector.load %arg1[%c0, %c0_0] : memref<8x256xf32, #tpu.memory_space<vmem>>, vector<8x256xf32>
    %cst = arith.constant 0.785398185 : f32
    %1 = vector.broadcast %cst : f32 to vector<8x256xf32>
    %2 = arith.mulf %1, %0 : vector<8x256xf32>
    %cst_1 = arith.constant 0.785398185 : f32
    %3 = vector.broadcast %cst_1 : f32 to vector<8x256xf32>
    %4 = arith.addf %2, %3 : vector<8x256xf32>
    %5 = math.cos %4 : vector<8x256xf32>
    %cst_2 = arith.constant 5.000000e-01 : f32
    %6 = vector.broadcast %cst_2 : f32 to vector<8x256xf32>
    %7 = arith.mulf %6, %5 : vector<8x256xf32>
    %cst_3 = arith.constant 5.000000e-01 : f32
    %8 = vector.broadcast %cst_3 : f32 to vector<8x256xf32>
    %9 = arith.subf %8, %7 : vector<8x256xf32>
    %c0_4 = arith.constant 0 : index
    %c0_5 = arith.constant 0 : index
    %10 = vector.load %arg2[%c0_4, %c0_5] : memref<8x256xf32, #tpu.memory_space<vmem>>, vector<8x256xf32>
    tpu.vector_store %arg2[%c0_4, %c0_5], %9 {strides = array<i32>} : memref<8x256xf32, #tpu.memory_space<vmem>>, vector<8x256xf32>,
    return
  }
  func.func @transform_0(%arg0: i32) -> (i32, i32) {
    %c0_i32 = arith.constant 0 : i32
    %c0_i32_0 = arith.constant 0 : i32
    return %arg0, %c0_i32 : i32, i32
  }
  func.func @transform_1(%arg0: i32) -> (i32, i32) {
    %c0_i32 = arith.constant 0 : i32
    %c0_i32_0 = arith.constant 0 : i32
    return %arg0, %c0_i32 : i32, i32
  }
}

</mosaic_0001>

<bundles_post_ra>
// kernel: _cosine_pallas.1
= control target key start
LH: loop header
LB: loop body
LE: loop exit
PB: predicated region body
PF: predicated region fallthrough
CT: control target
= control target key end

     0   :  { %v345_v27 = vmov 683565275   ;;  %v346_v29 = vmov 2475754826   ;;  %v347_v31 = vmov 2131351028   ;;  %s555_s0 = inlined_call_operand.vmem [shape: f32[8,256], index: 0, kind: input, shape index: {}]   ;;  %s556_s1 = inlined_call_operand.vmem [shape: f32[8,256], index: 1, kind: output, shape index: {}]  }
   0x1   :  { %v8_v0 = vld [vmem:[%s555_s0] sm:$0xff]  ;;  %v9_v1 = vld [vmem:[%s555_s0 + $0x8] sm:$0xff]  ;;  %v348_v33 = vmov 2102212464   ;;  %v349_v35 = vmov 920167782  }
   0x2   :  { %v10_v2 = vmul.f32 0.7853982, %v8_v0  ;;  %v11_v3 = vmul.f32 0.7853982, %v9_v1  ;;  %v350_v44 = vmov 1326507024  }
   0x4   :  { %v368_v4 = vadd.f32 0.7853982, %v10_v2  ;;  %v370_v5 = vadd.f32 0.7853982, %v11_v3 }
   0x6   :  { %v14_v6 = vand.u32 2147483647, %v368_v4  ;;  %v17_v7 = vand.u32 2139095040, %v368_v4  ;;  %v168_v8 = vand.u32 2147483647, %v370_v5  ;;  %v171_v9 = vand.u32 2139095040, %v370_v5 }
   0x8   :  { %v18_v10 = vshrl.u32 %v17_v7, 23  ;;  %v21_v11 = vand.u32 8388607, %v14_v6  ;;  %v172_v12 = vshrl.u32 %v171_v9, 23  ;;  %v175_v16 = vand.u32 8388607, %v168_v8 }
   0xa   :  { %v332_v13 = vadd.s32 4294967169, %v18_v10  ;;  %v22_v14 = vor.u32 8388608, %v21_v11  ;;  %v335_v15 = vadd.s32 4294967169, %v172_v12  ;;  %v176_v21 = vor.u32 8388608, %v175_v16 }
   0xc   :  { %v24_v17 = vadd.s32 1, %v332_v13  ;;  %v178_v18 = vadd.s32 1, %v335_v15  ;;  %v380_v20 = vshll.u32 %v22_v14, 8  ;;  %v390_v38 = vshll.u32 %v176_v21, 8 }
   0xe   :  { %vm25_vm0 = vcmp.gt.s32.totalorder %v24_v17, 0  ;;  %vm179_vm1 = vcmp.gt.s32.totalorder %v178_v18, 0  ;;  %v63_v37 = vand.u32 65535, %v380_v20  ;;  %v64_v42 = vshrl.u32 %v380_v20, 16 }
   0xf   :  { %v26_v19 = vsel %vm25_vm0, %v24_v17, 0  ;;  %v180_v23 = vsel %vm179_vm1, %v178_v18, 0 }
  0x10   :  { %v28_v22 = vand.u32 31, %v26_v19  ;;  %v382_v24 = vshrl.u32 %v26_v19, 5  ;;  %v384_v25 = vand.u32 31, %v180_v23  ;;  %v408_v55 = vshrl.u32 %v180_v23, 5 }
  0x12   :  { %v29_v26 = vsub.s32 32, %v28_v22  ;;  %v31_v28 = vshll.u32 %v345_v27, %v28_v22  ;;  %v34_v30 = vshll.u32 %v346_v29, %v28_v22  ;;  %v37_v32 = vshll.u32 %v347_v31, %v28_v22 }
  0x13   :  { %v40_v34 = vshll.u32 %v348_v33, %v28_v22  ;;  %v43_v36 = vshll.u32 %v349_v35, %v28_v22  ;;  %vm46_vm2 = vcmp.lt.s32.totalorder %v382_v24, 1  ;;  %vm49_vm3 = vcmp.lt.s32.totalorder %v382_v24, 4 }
  0x14   :  { %v32_v39 = vshrl.u32 %v346_v29, %v29_v26  ;;  %v35_v40 = vshrl.u32 %v347_v31, %v29_v26  ;;  %v38_v41 = vshrl.u32 %v348_v33, %v29_v26  ;;  %v41_v43 = vshrl.u32 %v349_v35, %v29_v26 }
  0x15   :  { %v44_v45 = vshrl.u32 %v350_v44, %v29_v26  ;;  %v399_v49 = vsub.s32 32, %v384_v25  ;;  %v30_v50 = vshrl.u32 %v345_v27, %v29_v26  ;;  %vm48_vm4 = vcmp.lt.s32.totalorder %v382_v24, 3 }
  0x16   :  { %v33_v46 = vor.u32 %v32_v39, %v31_v28  ;;  %v36_v47 = vor.u32 %v35_v40, %v34_v30  ;;  %v39_v48 = vor.u32 %v38_v41, %v37_v32  ;;  %v42_v51 = vor.u32 %v41_v43, %v40_v34 }
  0x17   :  { %v45_v52 = vor.u32 %v44_v45, %v43_v36  ;;  %vm47_vm5 = vcmp.lt.s32.totalorder %v382_v24, 2  ;;  %v185_v58 = vshll.u32 %v345_v27, %v384_v25  ;;  %v188_v59 = vshll.u32 %v346_v29, %v384_v25 }
  0x18   :  { %v54_v53 = vsel %vm46_vm2, %v33_v46, %v36_v47  ;;  %v58_v54 = vsel %vm46_vm2, %v36_v47, %v39_v48  ;;  %v55_v56 = vsel %vm49_vm3, %v42_v51, 920167782  ;;  %v51_v60 = vsel %vm49_vm3, %v39_v48, 2102212464 }
  0x19   :  { %v59_v57 = vsel %vm49_vm3, %v45_v52, 1326507024  ;;  %v56_v61 = vsel %vm48_vm4, %v39_v48, %v55_v56  ;;  %v186_v63 = vshrl.u32 %v346_v29, %v399_v49  ;;  %v50_v0 = vsel %vm46_vm2, %v30_v50, %v33_v46 }
  0x1a   :  { %v60_v62 = vsel %vm48_vm4, %v42_v51, %v59_v57  ;;  %v57_v1 = vsel %vm47_vm5, %v54_v53, %v56_v61  ;;  %v189_v3 = vshrl.u32 %v347_v31, %v399_v49  ;;  %v52_v12 = vsel %vm48_vm4, %v36_v47, %v51_v60 }
  0x1b   :  { %v61_v2 = vsel %vm47_vm5, %v58_v54, %v60_v62  ;;  %v87_v10 = vand.u32 65535, %v57_v1  ;;  %v88_v11 = vshrl.u32 %v57_v1, 16  ;;  %v433_v13 = vor.u32 %v186_v63, %v185_v58 }
  0x1c   :  { %v65_v7 = vand.u32 65535, %v61_v2  ;;  %v66_v9 = vshrl.u32 %v61_v2, 16  ;;  %v435_v14 = vor.u32 %v189_v3, %v188_v59  ;;  %v191_v15 = vshll.u32 %v347_v31, %v384_v25 }
  0x1d   :  { %v192_v19 = vshrl.u32 %v348_v33, %v399_v49  ;;  %v89_v22 = vmul.u32 %v87_v10, %v63_v37  ;;  %v90_v23 = vmul.u32 %v88_v11, %v63_v37  ;;  %v91_v26 = vmul.u32 %v87_v10, %v64_v42 }
  0x1e   :  { %v67_v16 = vmul.u32 %v65_v7, %v63_v37  ;;  %v68_v17 = vmul.u32 %v66_v9, %v63_v37  ;;  %v69_v18 = vmul.u32 %v65_v7, %v64_v42  ;;  %v70_v21 = vmul.u32 %v66_v9, %v64_v42 }
  0x1f   :  { %v92_v32 = vmul.u32 %v88_v11, %v64_v42  ;;  %v93_v36 = vshll.u32 %v90_v23, 16  ;;  %v94_v39 = vshrl.u32 %v90_v23, 16  ;;  %v95_v40 = vshll.u32 %v91_v26, 16 }
  0x20   :  { %v71_v28 = vshll.u32 %v68_v17, 16  ;;  %v72_v29 = vshrl.u32 %v68_v17, 16  ;;  %v73_v30 = vshll.u32 %v69_v18, 16  ;;  %v74_v34 = vshrl.u32 %v69_v18, 16 }
  0x21   :  { %v96_v41 = vshrl.u32 %v91_v26, 16  ;;  %v194_v43 = vshll.u32 %v348_v33, %v384_v25  ;;  %v351_v45 = vmov 0   ;;  %vm97_vm7 = vc.u32 %v89_v22, %v93_v36 }
  0x22   :  { %vm75_vm6 = vc.u32 %v67_v16, %v71_v28  ;;  %v77_v31 = vadd.s32 %v71_v28, %v67_v16  ;;  %v99_v37 = vadd.s32 %v93_v36, %v89_v22  ;;  %v195_v47 = vshrl.u32 %v349_v35, %v399_v49 }
  0x23   :  { %v76_v46 = vsel %vm75_vm6, 1, %v351_v45  ;;  %v98_v42 = vsel %vm97_vm7, 1, %v351_v45  ;;  %v197_v50 = vshll.u32 %v349_v35, %v384_v25  ;;  %v193_v33 = vor.u32 %v192_v19, %v191_v15 }
  0x24   :  { %v78_v48 = vadd.s32 %v76_v46, %v70_v21  ;;  %vm79_vm8 = vc.u32 %v77_v31, %v73_v30  ;;  %v100_v52 = vadd.s32 %v98_v42, %v92_v32  ;;  %vm101_vm9 = vc.u32 %v99_v37, %v95_v40 }
  0x25   :  { %v80_v51 = vsel %vm79_vm8, 1, %v351_v45  ;;  %v102_v54 = vsel %vm101_vm9, 1, %v351_v45  ;;  %v196_v56 = vor.u32 %v195_v47, %v194_v43  ;;  %v198_v57 = vshrl.u32 %v350_v44, %v399_v49 }
  0x26   :  { %v82_v53 = vadd.s32 %v80_v51, %v78_v48  ;;  %v452_v58 = vadd.s32 %v99_v37, %v95_v40  ;;  %v104_v59 = vadd.s32 %v102_v54, %v100_v52  ;;  %vm200_vm10 = vcmp.lt.s32.totalorder %v408_v55, 1 }
  0x27   :  { %vm202_vm11 = vcmp.lt.s32.totalorder %v408_v55, 3  ;;  %v199_v35 = vor.u32 %v198_v57, %v197_v50  ;;  %vm201_vm12 = vcmp.lt.s32.totalorder %v408_v55, 2  ;;  %vm203_vm13 = vcmp.lt.s32.totalorder %v408_v55, 4 }
  0x28   :  { %v83_v25 = vadd.s32 %v82_v53, %v72_v29  ;;  %v53_v60 = vsel %vm47_vm5, %v50_v0, %v52_v12  ;;  %v105_v61 = vadd.s32 %v104_v59, %v94_v39  ;;  %v208_v44 = vsel %vm200_vm10, %v433_v13, %v435_v14 }
  0x29   :  { %v209_v62 = vsel %vm203_vm13, %v196_v56, 920167782  ;;  %v212_v2 = vsel %vm200_vm10, %v435_v14, %v193_v33  ;;  %v217_v24 = vand.u32 65535, %v390_v38  ;;  %v213_v7 = vsel %vm203_vm13, %v199_v35, 1326507024 }
  0x2a   :  { %v466_v63 = vadd.s32 %v83_v25, %v74_v34  ;;  %v210_v1 = vsel %vm202_vm11, %v193_v33, %v209_v62  ;;  %v106_v0 = vadd.s32 %v105_v61, %v96_v41  ;;  %v218_v9 = vshrl.u32 %v390_v38, 16 }
  0x2b   :  { %v211_v3 = vsel %vm201_vm12, %v208_v44, %v210_v1  ;;  %v107_v10 = vmul.u32 %v380_v20, %v53_v60  ;;  %v214_v11 = vsel %vm202_vm11, %v196_v56, %v213_v7  ;;  %v184_v22 = vshrl.u32 %v345_v27, %v399_v49 }
  0x2c   :  { %vm109_vm14 = vc.u32 %v466_v63, %v452_v58  ;;  %v241_v12 = vand.u32 65535, %v211_v3  ;;  %v110_v15 = vadd.s32 1, %v106_v0  ;;  %v215_v16 = vsel %vm201_vm12, %v212_v2, %v214_v11 }
  0x2d   :  { %v242_v17 = vshrl.u32 %v211_v3, 16  ;;  %v219_v18 = vand.u32 65535, %v215_v16  ;;  %v220_v19 = vshrl.u32 %v215_v16, 16  ;;  %v205_v39 = vsel %vm203_vm13, %v193_v33, 2102212464 }
  0x2e   :  { %v111_v21 = vsel %vm109_vm14, %v110_v15, %v106_v0  ;;  %v245_v20 = vmul.u32 %v241_v12, %v218_v9  ;;  %v243_v30 = vmul.u32 %v241_v12, %v217_v24  ;;  %v204_v41 = vsel %vm200_vm10, %v184_v22, %v433_v13 }
  0x2f   :  { %v244_v23 = vmul.u32 %v242_v17, %v217_v24  ;;  %v112_v26 = vadd.s32 %v111_v21, %v107_v10  ;;  %v221_v28 = vmul.u32 %v219_v18, %v217_v24  ;;  %v222_v29 = vmul.u32 %v220_v19, %v217_v24 }
  0x30   :  { %v223_v32 = vmul.u32 %v219_v18, %v218_v9  ;;  %v224_v40 = vmul.u32 %v220_v19, %v218_v9  ;;  %v246_v27 = vmul.u32 %v242_v17, %v218_v9  ;;  %v249_v49 = vshll.u32 %v245_v20, 16 }
  0x31   :  { %v247_v34 = vshll.u32 %v244_v23, 16  ;;  %v113_v36 = vadd.s32 536870912, %v112_v26  ;;  %v225_v31 = vshll.u32 %v222_v29, 16  ;;  %v206_v47 = vsel %vm202_vm11, %v435_v14, %v205_v39 }
  0x32   :  { %v227_v43 = vshll.u32 %v223_v32, 16  ;;  %v226_v13 = vshrl.u32 %v222_v29, 16  ;;  %v248_v53 = vshrl.u32 %v244_v23, 16  ;;  %v228_v57 = vshrl.u32 %v223_v32, 16 }
  0x33   :  { %v493_v46 = vshrl.u32 %v113_v36, 30  ;;  %vm229_vm15 = vc.u32 %v221_v28, %v225_v31  ;;  %v231_v37 = vadd.s32 %v225_v31, %v221_v28  ;;  %vm251_vm0 = vc.u32 %v243_v30, %v247_v34 }
  0x34   :  { %v230_v48 = vsel %vm229_vm15, 1, %v351_v45  ;;  %v252_v42 = vsel %vm251_vm0, 1, %v351_v45  ;;  %v253_v50 = vadd.s32 %v247_v34, %v243_v30  ;;  %v250_v25 = vshrl.u32 %v245_v20, 16 }
  0x35   :  { %v115_v51 = vshll.u32 %v493_v46, 30  ;;  %v232_v52 = vadd.s32 %v230_v48, %v224_v40  ;;  %vm233_vm1 = vc.u32 %v231_v37, %v227_v43  ;;  %v254_v54 = vadd.s32 %v252_v42, %v246_v27 }
  0x36   :  { %v234_v33 = vsel %vm233_vm1, 1, %v351_v45  ;;  %vm255_vm2 = vc.u32 %v253_v50, %v249_v49  ;;  %v257_v44 = vadd.s32 %v253_v50, %v249_v49  ;;  %v207_v62 = vsel %vm201_vm12, %v204_v41, %v206_v47 }
  0x37   :  { %v116_v56 = vsub.s32 %v112_v26, %v115_v51  ;;  %v236_v59 = vadd.s32 %v234_v33, %v232_v52  ;;  %v256_v14 = vsel %vm255_vm2, 1, %v351_v45  ;;  %v261_v7 = vmul.u32 %v390_v38, %v207_v62 }
  0x38   :  { %v258_v35 = vadd.s32 %v256_v14, %v254_v54  ;;  %v108_v45 = vadd.s32 %v452_v58, %v466_v63  ;;  %vm16_vm7 = vcmp.lt.s32.totalorder %v368_v4, 0  ;;  %vm514_vm8 = vcmp.le.f32.partialorder %v14_v6, 0.7853982 }
  0x39   :  { %vm117_vm3 = vcmp.lt.s32.totalorder %v116_v56, 0  ;;  %v118_v60 = vsub.s32 0, %v116_v56  ;;  %v237_v61 = vadd.s32 %v236_v59, %v226_v13  ;;  %v138_v41 = vsub.s32 4, %v493_v46 }
  0x3a   :  { %v259_v1 = vadd.s32 %v258_v35, %v248_v53  ;;  %vm170_vm11 = vcmp.lt.s32.totalorder %v370_v5, 0  ;;  %vm532_vm13 = vcmp.le.f32.partialorder %v168_v8, 0.7853982  ;;  %vm157_vm15 = vweird.f32 %v368_v4 }
  0x3b   :  { %v119_v2 = vsel %vm117_vm3, %v118_v60, %v116_v56  ;;  %v238_v24 = vadd.s32 %v237_v61, %v228_v57  ;;  %v139_v50 = vsel %vm16_vm7, %v138_v41, %v493_v46  ;;  %vm311_vm3 = vweird.f32 %v370_v5 }
  0x3c   :  { %v120_v0 = vclz %v119_v2  ;;  %v260_v3 = vadd.s32 %v259_v1, %v250_v25  ;;  %v141_v54 = vsel %vm514_vm8, 0, %v139_v50 }
  0x3d   :  { %vm263_vm4 = vc.u32 %v238_v24, %v257_v44  ;;  %v262_v49 = vadd.s32 %v257_v44, %v238_v24  ;;  %v158_v60 = vand.u32 3, %v141_v54 }
  0x3e   :  { %v333_v9 = vadd.s32 4294967294, %v120_v0  ;;  %v264_v10 = vadd.s32 1, %v260_v3 }
  0x3f   :  { %vm163_vm10 = vcmp.eq.s32.totalorder %v158_v60, 2  ;;  %vm160_vm12 = vcmp.eq.s32.totalorder %v158_v60, 0  ;;  %vm159_vm14 = vcmp.lt.s32.totalorder %v158_v60, 2 }
  0x40   :  { %vm334_vm5 = vcmp.lt.s32.totalorder %v333_v9, 0  ;;  %v265_v11 = vsel %vm263_vm4, %v264_v10, %v260_v3 }
  0x41   :  { %v123_v12 = vsel %vm334_vm5, 0, %v333_v9  ;;  %v266_v15 = vadd.s32 %v265_v11, %v261_v7 }
  0x42   :  { %v124_v16 = vsub.s32 32, %v123_v12  ;;  %v125_v55 = vshll.u32 %v116_v56, %v123_v12  ;;  %v128_v17 = vsub.s32 4294967266, %v123_v12 }
  0x43   :  { %v267_v18 = vadd.s32 536870912, %v266_v15 }
  0x44   :  { %v126_v19 = vshrl.u32 %v108_v45, %v124_v16  ;;  %v129_v21 = vadd.s32 127, %v128_v17 }
  0x45   :  { %v508_v22 = vshrl.u32 %v267_v18, 30 }
  0x46   :  { %v127_v23 = vor.u32 %v126_v19, %v125_v55  ;;  %v130_v38 = vshll.u32 %v129_v21, 23 }
  0x47   :  { %v269_v20 = vshll.u32 %v508_v22, 30  ;;  %v292_v16 = vsub.s32 4, %v508_v22 }
  0x48   :  { %v131_v26 = vor.u32 4788187, %v130_v38  ;;  %v134_v28 = vcvt.s32.f32 %v127_v23 }
  0x49   :  { %v270_v29 = vsub.s32 %v266_v15, %v269_v20 }
  0x4a   :  { %v132_v58 = vand.u32 2147483647, %v131_v26 }
  0x4b   :  { %vm271_vm6 = vcmp.lt.s32.totalorder %v270_v29, 0  ;;  %v272_v63 = vsub.s32 0, %v270_v29 }
  0x4c   :  { %v135_v30 = vmul.f32 %v134_v28, %v132_v58 }
  0x4d   :  { %v273_v32 = vsel %vm271_vm6, %v272_v63, %v270_v29 }
  0x4e   :  { %v136_v36 = vxor.u32 2147483648, %v135_v30  ;;  %v274_v39 = vclz %v273_v32 }
  0x50   :  { %v137_v40 = vsel %vm16_vm7, %v136_v36, %v135_v30  ;;  %v336_v31 = vadd.s32 4294967294, %v274_v39 }
  0x51   :  { %v140_v43 = vsel %vm514_vm8, %v368_v4, %v137_v40  ;;  %v293_v4 = vsel %vm170_vm11, %v292_v16, %v508_v22 }
  0x52   :  { %v142_v27 = vmul.f32 %v140_v43, %v140_v43  ;;  %vm337_vm9 = vcmp.lt.s32.totalorder %v336_v31, 0  ;;  %v295_v28 = vsel %vm532_vm13, 0, %v293_v4 }
  0x53   :  { %v277_v37 = vsel %vm337_vm9, 0, %v336_v31  ;;  %v312_v32 = vand.u32 3, %v295_v28 }
  0x54   :  { %v143_v6 = vmul.f32 -0.001358992, %v142_v27  ;;  %v150_v47 = vmul.f32 -0.00019511016, %v142_v27  ;;  %v278_v48 = vsub.s32 32, %v277_v37  ;;  %v279_v42 = vshll.u32 %v270_v29, %v277_v37 }
  0x55   :  { %v282_v51 = vsub.s32 4294967266, %v277_v37  ;;  %vm317_vm0 = vcmp.eq.s32.totalorder %v312_v32, 2  ;;  %vm314_vm1 = vcmp.eq.s32.totalorder %v312_v32, 0  ;;  %vm313_vm2 = vcmp.lt.s32.totalorder %v312_v32, 2 }
  0x56   :  { %v144_v13 = vadd.f32 0.041655596, %v143_v6  ;;  %v151_v52 = vadd.f32 0.008332121, %v150_v47  ;;  %v280_v33 = vshrl.u32 %v262_v49, %v278_v48 }
  0x57   :  { %v283_v53 = vadd.s32 127, %v282_v51 }
  0x58   :  { %v145_v56 = vmul.f32 %v144_v13, %v142_v27  ;;  %v152_v57 = vmul.f32 %v151_v52, %v142_v27  ;;  %v281_v59 = vor.u32 %v280_v33, %v279_v42 }
  0x59   :  { %v284_v14 = vshll.u32 %v283_v53, 23 }
  0x5a   :  { %v146_v25 = vadd.f32 -0.4999988, %v145_v56  ;;  %v153_v35 = vadd.f32 -0.16666654, %v152_v57  ;;  %v288_v44 = vcvt.s32.f32 %v281_v59 }
  0x5b   :  { %v285_v61 = vor.u32 4788187, %v284_v14 }
  0x5c   :  { %v147_v62 = vmul.f32 %v146_v25, %v142_v27  ;;  %v154_v1 = vmul.f32 %v153_v35, %v142_v27 }
  0x5d   :  { %v286_v46 = vand.u32 2147483647, %v285_v61 }
  0x5e   :  { %v148_v2 = vadd.f32 1.0, %v147_v62  ;;  %v155_v24 = vadd.f32 1.0, %v154_v1 }
  0x5f   :  { %v289_v0 = vmul.f32 %v288_v44, %v286_v46 }
  0x60   :  { %v156_v3 = vmul.f32 %v155_v24, %v140_v43  ;;  %v164_v7 = vxor.u32 2147483648, %v148_v2 }
  0x61   :  { %v290_v10 = vxor.u32 2147483648, %v289_v0 }
  0x62   :  { %v161_v45 = vxor.u32 2147483648, %v156_v3  ;;  %v165_v11 = vsel %vm163_vm10, %v164_v7, %v156_v3 }
  0x63   :  { %v291_v12 = vsel %vm170_vm11, %v290_v10, %v289_v0 }
  0x64   :  { %v162_v15 = vsel %vm160_vm12, %v148_v2, %v161_v45  ;;  %v294_v55 = vsel %vm532_vm13, %v370_v5, %v291_v12 }
  0x65   :  { %v166_v8 = vsel %vm159_vm14, %v162_v15, %v165_v11  ;;  %v296_v17 = vmul.f32 %v294_v55, %v294_v55 }
  0x66   :  { %v167_v18 = vsel %vm157_vm15, nan, %v166_v8 }
  0x67   :  { %v297_v19 = vmul.f32 -0.001358992, %v296_v17  ;;  %v304_v21 = vmul.f32 -0.00019511016, %v296_v17  ;;  %v322_v23 = vmul.f32 0.5, %v167_v18 }
  0x69   :  { %v298_v38 = vadd.f32 0.041655596, %v297_v19  ;;  %v305_v20 = vadd.f32 0.008332121, %v304_v21  ;;  %v324_v26 = vsub.f32 0.5, %v322_v23 }
  0x6b   :  { %v299_v29 = vmul.f32 %v298_v38, %v296_v17  ;;  %v306_v58 = vmul.f32 %v305_v20, %v296_v17  ;;  %326 = vst [vmem:[%s556_s1] sm:$0xff] %v324_v26 }
  0x6d   :  { %v300_v63 = vadd.f32 -0.4999988, %v299_v29  ;;  %v307_v30 = vadd.f32 -0.16666654, %v306_v58 }
  0x6f   :  { %v301_v34 = vmul.f32 %v300_v63, %v296_v17  ;;  %v308_v36 = vmul.f32 %v307_v30, %v296_v17 }
  0x71   :  { %v302_v39 = vadd.f32 1.0, %v301_v34  ;;  %v309_v40 = vadd.f32 1.0, %v308_v36 }
  0x73   :  { %v310_v22 = vmul.f32 %v309_v40, %v294_v55  ;;  %v318_v31 = vxor.u32 2147483648, %v302_v39 }
  0x75   :  { %v315_v41 = vxor.u32 2147483648, %v310_v22  ;;  %v319_v43 = vsel %vm317_vm0, %v318_v31, %v310_v22 }
  0x77   :  { %v316_v27 = vsel %vm314_vm1, %v302_v39, %v315_v41 }
  0x78   :  { %v320_v49 = vsel %vm313_vm2, %v316_v27, %v319_v43 }
  0x79   :  { %v321_v37 = vsel %vm311_vm3, nan, %v320_v49 }
  0x7a   :  { %v323_v6 = vmul.f32 0.5, %v321_v37 }
  0x7c   :  { %v325_v47 = vsub.f32 0.5, %v323_v6 }
  0x7e   :  { %327 = vst [vmem:[%s556_s1 + $0x8] sm:$0xff] %v325_v47 }

</bundles_post_ra>
